<compile_context>
chip_gen: v5e
topology: v5e:2x2
jax: 0.10.0
libtpu: 0.0.40
codegen_flags: <defaults>
</compile_context>

<pallas_src>
import functools
import math

import jax
import jax.numpy as jnp
from jax import lax
from jax.experimental import pallas as pl
from jax.experimental.pallas import tpu as pltpu


def _round_up(v, m):
    return ((v + m - 1) // m) * m


@functools.lru_cache(maxsize=1)
def _hw_params():
    """(vmem_budget_bytes, num_tensorcores) for the attached TPU generation."""
    kind = ""
    try:
        kind = jax.devices()[0].device_kind.lower()
    except Exception:  # pragma: no cover - defensive; fall back to v7x-safe numbers
        pass
    if "v7" in kind:
        # v7x: 64 MiB physical VMEM per TC, 2 TCs per chip.
        return 48 << 20, 2
    # v4 / v5e / v6e: 128 MiB physical VMEM.
    return 96 << 20, 1


def prepare_linear_params(weight, bias):
    """One-time (parameter-load-time) prep.

    PyTorch weight [out, in] -> [in, out] so the kernel's contraction is the
    canonical MXU [M,K] x [K,N] feed; bias kept 2-D (1, out) for TPU layout.
    """
    w_t = jnp.asarray(weight).T
    b2d = jnp.asarray(bias).reshape(1, -1)
    return w_t, b2d


# ----------------------------- kernels --------------------------------------


def _linear_kernel_single_k(x_ref, w_ref, b_ref, o_ref):
    """Whole reduction in one step: no accumulator scratch, no branches."""
    acc = lax.dot_general(
        x_ref[...], w_ref[...],
        dimension_numbers=(((1,), (0,)), ((), ())),
        preferred_element_type=jnp.float32,
    )
    o_ref[...] = (acc + b_ref[...].astype(jnp.float32)).astype(o_ref.dtype)


def _linear_kernel_multi_k(x_ref, w_ref, b_ref, o_ref, acc_ref):
    """K split across grid axis 2; f32 accumulator with bias folded into init."""
    k = pl.program_id(2)

    @pl.when(k == 0)
    def _init():
        # Fold bias into the init -> finalize is a pure cast+store.
        acc_ref[...] = jnp.broadcast_to(
            b_ref[...].astype(jnp.float32), acc_ref.shape)

    acc_ref[...] += lax.dot_general(
        x_ref[...], w_ref[...],
        dimension_numbers=(((1,), (0,)), ((), ())),
        preferred_element_type=jnp.float32,
    )

    @pl.when(k == pl.num_programs(2) - 1)
    def _finalize():
        o_ref[...] = acc_ref[...].astype(o_ref.dtype)


# ----------------------------- wrapper --------------------------------------


def _pick_tiles(B, K, N, in_itemsize, out_itemsize, budget, num_tc):
    # tm multiple of 8 (or == B), tn multiple of 128 (or == N); both capped at
    # 512 so double-buffered panels stay within v7x's 64 MiB physical VMEM.
    tm = B if B <= 512 else 512
    tn = N if N <= 512 else 512

    # Give every TensorCore at least one (i, j) tile (v7x has 2 per chip).
    if num_tc > 1 and pl.cdiv(B, tm) * pl.cdiv(N, tn) < num_tc:
        if B >= 16:
            tm = _round_up(pl.cdiv(B, num_tc), 8)
        elif N >= 256:
            tn = _round_up(pl.cdiv(N, num_tc), 128)

    def fits(tk):
        panels = in_itemsize * 2 * tk * (tm + tn)   # double-buffered x / W panels
        acc = 4 * tm * tn                           # f32 accumulator (multi-k only)
        outb = out_itemsize * 2 * tm * tn           # double-buffered output tile
        return panels + acc + outb <= int(budget * 0.6)

    if fits(K):
        tk = K          # single k step: no accumulator RMW, no K padding
    else:
        tk = 2048
        while tk > 512 and not fits(tk):
            tk //= 2
    return tm, tn, tk


@functools.partial(
    jax.jit,
    static_argnames=("tm", "tn", "tk", "force_pallas", "compute_dtype"))
def linear_forward(x, w_t, bias2d, *, tm=None, tn=None, tk=None,
                   force_pallas=False, compute_dtype=None):
    """x: [B, K]; w_t: [K, N] (pre-transposed weight); bias2d: [1, N] -> [B, N]."""
    B, K = x.shape
    K2, N = w_t.shape
    assert K == K2 and bias2d.shape == (1, N)
    out_dtype = x.dtype

    # Small-shape fast path: a standalone pallas_call can't beat a fused XLA
    # GEMM when launch + pipeline prologue dominate (e.g. 8x32x8).
    if (not force_pallas and tm is None and tn is None and tk is None
            and B * N * K < (1 << 21)):
        return (jnp.dot(x, w_t, preferred_element_type=jnp.float32)
                + bias2d).astype(out_dtype)

    if compute_dtype is not None:
        # Opt-in reduced-precision inputs (f32 accumulation preserved).
        x = x.astype(compute_dtype)
        w_t = w_t.astype(compute_dtype)

    budget, num_tc = _hw_params()
    in_itemsize = x.dtype.itemsize
    out_itemsize = jnp.dtype(out_dtype).itemsize
    a_tm, a_tn, a_tk = _pick_tiles(B, K, N, in_itemsize, out_itemsize,
                                   budget, num_tc)
    tm = a_tm if tm is None else tm
    tn = a_tn if tn is None else tn
    tk = a_tk if tk is None else tk

    # Zero-pad K only when the reduction is split with a remainder (rare; K is
    # usually a multiple of tk). M/N remainders need no padding: partially
    # out-of-bounds blocks only feed output rows/cols that the masked edge
    # stores never write back.
    Kp = K if tk >= K else _round_up(K, tk)
    if Kp != K:
        x = jnp.pad(x, ((0, 0), (0, Kp - K)))
        w_t = jnp.pad(w_t, ((0, Kp - K), (0, 0)))

    gm, gn, gk = pl.cdiv(B, tm), pl.cdiv(N, tn), pl.cdiv(Kp, tk)

    # Scoped-VMEM request: footprint with headroom, clamped by the
    # generation-aware budget (v7x has half the VMEM of v5e/v6e).
    footprint = (in_itemsize * 2 * (tm * min(tk, Kp) + min(tk, Kp) * tn + tn)
                 + out_itemsize * 2 * tm * tn
                 + (4 * tm * tn if gk > 1 else 0))
    vmem_limit = int(min(max(2 * footprint, 4 << 20), budget))

    cost = pl.CostEstimate(
        flops=2 * B * N * Kp,
        transcendentals=0,
        bytes_accessed=in_itemsize * (B * Kp * gn + Kp * N * gm)
        + 4 * N + out_itemsize * B * N,
    )

    if gk == 1:
        # Single reduction step: dedicated kernel, no scratch, 2-D grid.
        return pl.pallas_call(
            _linear_kernel_single_k,
            out_shape=jax.ShapeDtypeStruct((B, N), out_dtype),
            grid=(gm, gn),
            in_specs=[
                pl.BlockSpec((tm, Kp), lambda i, j: (i, 0)),   # x panel
                pl.BlockSpec((Kp, tn), lambda i, j: (0, j)),   # W^T panel [K, N]
                pl.BlockSpec((1, tn), lambda i, j: (0, j)),    # bias
            ],
            out_specs=pl.BlockSpec((tm, tn), lambda i, j: (i, j)),
            compiler_params=pltpu.CompilerParams(
                dimension_semantics=("parallel", "parallel"),
                vmem_limit_bytes=vmem_limit,
            ),
            cost_estimate=cost,
        )(x, w_t, bias2d)

    return pl.pallas_call(
        _linear_kernel_multi_k,
        out_shape=jax.ShapeDtypeStruct((B, N), out_dtype),
        grid=(gm, gn, gk),
        in_specs=[
            pl.BlockSpec((tm, tk), lambda i, j, k: (i, k)),    # x tile
            pl.BlockSpec((tk, tn), lambda i, j, k: (k, j)),    # W^T tile [K, N]
            pl.BlockSpec((1, tn), lambda i, j, k: (0, j)),     # bias
        ],
        out_specs=pl.BlockSpec((tm, tn), lambda i, j, k: (i, j)),
        scratch_shapes=[pltpu.VMEM((tm, tn), jnp.float32)],
        compiler_params=pltpu.CompilerParams(
            dimension_semantics=("parallel", "parallel", "arbitrary"),
            vmem_limit_bytes=vmem_limit,
        ),
        cost_estimate=cost,
    )(x, w_t, bias2d)


if __name__ == "__main__":
    # Small shapes implied by nn.Linear(input_size, output_size).
    batch, input_size, output_size = 8, 32, 8

    key = jax.random.PRNGKey(0)
    kx, kw, kb = jax.random.split(key, 3)

    x = jax.random.normal(kx, (batch, input_size), dtype=jnp.float32)
    # Mirror PyTorch's default init U(-1/sqrt(in), 1/sqrt(in)).
    bound = 1.0 / math.sqrt(input_size)
    weight = jax.random.uniform(kw, (output_size, input_size),
                                minval=-bound, maxval=bound, dtype=jnp.float32)
    bias = jax.random.uniform(kb, (output_size,),
                              minval=-bound, maxval=bound, dtype=jnp.float32)

    w_t, b2d = prepare_linear_params(weight, bias)
    ref = x @ weight.T + bias

    # Exercise the Pallas kernel even at toy size (force past the fast path).
    out = linear_forward(x, w_t, b2d, force_pallas=True)
    jax.block_until_ready(out)
    assert out.shape == (batch, output_size)
    assert jnp.allclose(out, ref, atol=1e-5, rtol=1e-5)

    # Default dispatcher picks the fused-XLA fast path at this size.
    out_fast = linear_forward(x, w_t, b2d)
    jax.block_until_ready(out_fast)
    assert jnp.allclose(out_fast, ref, atol=1e-5, rtol=1e-5)

    # Larger multi-tile shape: single-k (full-K panel) Pallas path.
    Bx, Kx, Nx = 512, 1024, 384
    kx2, kw2, kb2 = jax.random.split(jax.random.PRNGKey(1), 3)
    x2 = jax.random.normal(kx2, (Bx, Kx), dtype=jnp.float32)
    w2 = jax.random.normal(kw2, (Nx, Kx), dtype=jnp.float32) * 0.02
    b2 = jax.random.normal(kb2, (Nx,), dtype=jnp.float32)
    w2_t, b2_2d = prepare_linear_params(w2, b2)
    out2 = linear_forward(x2, w2_t, b2_2d)
    jax.block_until_ready(out2)
    ref2 = x2 @ w2.T + b2
    assert jnp.allclose(out2, ref2, atol=1e-3, rtol=1e-3)

    # Force the multi-k accumulator path (K split, bias folded into init).
    out3 = linear_forward(x2, w2_t, b2_2d, tk=512)
    jax.block_until_ready(out3)
    assert jnp.allclose(out3, ref2, atol=1e-3, rtol=1e-3)

    print("KERNEL_OK")
</pallas_src>

<mosaic_0001>
module attributes {stable_mosaic.version = 11 : i64} {
  func.func @_linear_kernel_single_k(%arg0: i32, %arg1: i32, %arg2: memref<8x32xf32, #tpu.memory_space<vmem>>, %arg3: memref<32x8xf32, #tpu.memory_space<vmem>>, %arg4: memref<1x8xf32, #tpu.memory_space<vmem>>, %arg5: memref<8x8xf32, #tpu.memory_space<vmem>>) attributes {dimension_semantics = [#tpu.dimension_semantics<parallel>, #tpu.dimension_semantics<parallel>], iteration_bounds = array<i64: 1, 1>, scalar_prefetch = 0 : i64, scratch_operands = 0 : i64, tpu.core_type = #tpu.core_type<tc>, window_params = [{transform_indices = @transform_0, window_bounds = array<i64: 8, 32>}, {transform_indices = @transform_1, window_bounds = array<i64: 32, 8>}, {transform_indices = @transform_2, window_bounds = array<i64: 1, 8>}, {transform_indices = @transform_3, window_bounds = array<i64: 8, 8>}]} {
    %c0 = arith.constant 0 : index
    %c0_0 = arith.constant 0 : index
    %0 = vector.load %arg2[%c0, %c0_0] : memref<8x32xf32, #tpu.memory_space<vmem>>, vector<8x32xf32>
    %c0_1 = arith.constant 0 : index
    %c0_2 = arith.constant 0 : index
    %1 = vector.load %arg3[%c0_1, %c0_2] : memref<32x8xf32, #tpu.memory_space<vmem>>, vector<32x8xf32>
    %cst = arith.constant dense<0.000000e+00> : vector<8x8xf32>
    %2 = tpu.matmul %0, %1, %cst {dimension_numbers = #tpu.dot_dimension_numbers<[1], [0], [0], [1], [0, 0, 1, 1], [], []>} : vector<8x32xf32>, vector<32x8xf32>, vector<8x8xf32> -> vector<8x8xf32>
    %c0_3 = arith.constant 0 : index
    %c0_4 = arith.constant 0 : index
    %3 = vector.load %arg4[%c0_3, %c0_4] : memref<1x8xf32, #tpu.memory_space<vmem>>, vector<1x8xf32>
    %4 = vector.broadcast %3 : vector<1x8xf32> to vector<8x8xf32>
    %5 = arith.addf %2, %4 : vector<8x8xf32>
    %c0_5 = arith.constant 0 : index
    %c0_6 = arith.constant 0 : index
    %6 = vector.load %arg5[%c0_5, %c0_6] : memref<8x8xf32, #tpu.memory_space<vmem>>, vector<8x8xf32>
    tpu.vector_store %arg5[%c0_5, %c0_6], %5 {strides = array<i32>} : memref<8x8xf32, #tpu.memory_space<vmem>>, vector<8x8xf32>,
    return
  }
  func.func @transform_0(%arg0: i32, %arg1: i32) -> (i32, i32) {
    %c0_i32 = arith.constant 0 : i32
    %c0_i32_0 = arith.constant 0 : i32
    return %arg0, %c0_i32 : i32, i32
  }
  func.func @transform_1(%arg0: i32, %arg1: i32) -> (i32, i32) {
    %c0_i32 = arith.constant 0 : i32
    %c0_i32_0 = arith.constant 0 : i32
    return %c0_i32, %arg1 : i32, i32
  }
  func.func @transform_2(%arg0: i32, %arg1: i32) -> (i32, i32) {
    %c0_i32 = arith.constant 0 : i32
    %c0_i32_0 = arith.constant 0 : i32
    return %c0_i32, %arg1 : i32, i32
  }
  func.func @transform_3(%arg0: i32, %arg1: i32) -> (i32, i32) {
    %c0_i32 = arith.constant 0 : i32
    return %arg0, %arg1 : i32, i32
  }
}

</mosaic_0001>

<bundles_post_ra>
// kernel: linear_forward.1
= control target key start
LH: loop header
LB: loop body
LE: loop exit
PB: predicated region body
PF: predicated region fallthrough
CT: control target
= control target key end

     0   :  { %s137_s0 = inlined_call_operand.vmem [shape: f32[8,32], index: 0, kind: input, shape index: {}]   ;;  %s138_s1 = inlined_call_operand.vmem [shape: f32[32,8], index: 1, kind: input, shape index: {}]   ;;  %s139_s2 = inlined_call_operand.vmem [shape: f32[1,8], index: 2, kind: input, shape index: {}]   ;;  %s140_s3 = inlined_call_operand.hbm [shape: f32[8,8], index: 3, kind: output, shape index: {}]  }
   0x1   :  { %v19_v0 = vld [vmem:[%s138_s1 + $0x18] sm:$0xff]  ;;  %v18_v1 = vld [vmem:[%s138_s1 + $0x10] sm:$0xff]  ;;  %v17_v2 = vld [vmem:[%s138_s1 + $0x8] sm:$0xff] }
   0x2   :  { %40 = vmatpush.msra.mxu0 %v19_v0 }
   0x3   :  { %8 = vsyncpa [#allocation3], 0  ;;  %v16_v3 = vld [vmem:[%s138_s1] sm:$0xff]  ;;  %vm24_vm0 = vcmask 261120   ;;  %s95_s24 = smov [#allocation2]   ;;  %s57_s28 = sshll.u32 %s140_s3, 4  ;;  %s58_s28 = int_to_ptr.hbm [resolvable:$true] %s57_s28 }
   0x4   :  { %41 = vmatpush.msra.mxu0 %v18_v1  ;;  %v15_v4 = vld [vmem:[%s137_s0] sm:$0xff]  ;;  %s55_s25 = sshll.u32 %s95_s24, 4  ;;  %vm48_vm1 = vcmask 64512   ;;  %s56_s25 = int_to_ptr.vmem [resolvable:$true] %s55_s25 }
   0x5   :  { %v68_v5 = vld [vmem:[%s139_s2] ss:$0 sm:$0xff] }
   0x6   :  { %42 = vmatpush.msra.mxu0 %v17_v2 }
   0x8   :  { %43 = vmatpush.msra.mxu0 %v16_v3 }
   0x9   :  { %66 = vmatmul.msk.f32.vlgmr.msra.gmra.mxu0 %vm24_vm0, %v15_v4 }
  0x86   :  { %v45_v6 = vpop.f32.mrf.mxu0 }
  0x87   :  { %v46_v7 = vadd.f32 %v68_v5, %v45_v6 }
  0x89   :  { %49 = vst.msk [vmem:[#allocation2] sm:$0xff] %vm48_vm1, %v46_v7 }
  0x8a   :  { %60 = dma.vmem_to_hbm [thread:$0]  %s56_s25, 128, %s58_s28, [#allocation3]  }
  0x8b   :  { %93 = dma.done.wait [#allocation3], 128  }
  0x8c   :  { %94 = vsyncadd [#allocation3], 4294967168 }
  0x8d   :  { %65 = vsyncpa [#allocation3], 1 }

</bundles_post_ra>
